<compile_context>
chip_gen: v6e
topology: v6e:2x2x1
jax: 0.10.0
libtpu: 0.0.40
codegen_flags: <defaults>
</compile_context>

<pallas_src>
import math
import functools

import jax
import jax.numpy as jnp
from jax.experimental import pallas as pl
from jax.experimental.pallas import tpu as pltpu

LN_EPS = 1e-5
LOG2E = 1.4426950408889634

# memory-space handle (MemorySpace on current JAX; TPUMemorySpace on older releases)
_MS = getattr(pltpu, "MemorySpace", None) or getattr(pltpu, "TPUMemorySpace")


# ---------------------------------------------------------------------------
# in-kernel helpers
# ---------------------------------------------------------------------------
def _layer_norm(x, gamma, beta):
    # x: (S, D) f32, gamma/beta: (1, D)
    mu = jnp.mean(x, axis=-1, keepdims=True)
    var = jnp.mean((x - mu) ** 2, axis=-1, keepdims=True)
    return (x - mu) * jax.lax.rsqrt(var + LN_EPS) * gamma + beta


def _make_shift_masks(S, shifts):
    """One (S, 1) iota, one (S, 1) predicate per static shift, reused by both convs."""
    rows = jax.lax.broadcasted_iota(jnp.int32, (S, 1), 0)
    masks = {}
    for sh in shifts:
        if sh == 0:
            masks[sh] = None
        elif sh > 0:
            masks[sh] = rows >= sh
        else:
            masks[sh] = rows < S + sh
    return masks


def _shifted_rows(x, shift, valid):
    """y[s, :] = x[s - shift, :] if 0 <= s - shift < S else 0.  `shift` is static."""
    S = x.shape[0]
    if shift == 0:
        return x
    rolled = pltpu.roll(x, shift % S, axis=0)        # XLU sublane rotate
    return jnp.where(valid, rolled, jnp.zeros_like(rolled))   # (S,1) mask broadcasts


def _choose_tq(S):
    """Query-chunk size: whole S when small, else the largest power-of-two divisor <= 512."""
    if S <= 512:
        return S
    for t in (512, 256, 128, 64, 32, 16, 8):
        if S % t == 0:
            return t
    return S


# ---------------------------------------------------------------------------
# Fused FFT-block layer kernel (whole layer, one grid step per batch element)
# ---------------------------------------------------------------------------
def _fft_layer_kernel(x_ref, kmask_ref, pmask_ref,
                      ln1_g_ref, ln1_b_ref, wqkv_ref, bqkv_ref, wo_ref, bo_ref,
                      ln2_g_ref, ln2_b_ref, w1_ref, b1_ref, w2_ref, b2_ref,
                      o_ref, q_scr, ctx_scr,
                      *, num_heads, ksize, padding, tq):
    x = x_ref[0].astype(jnp.float32)            # (S, D) residual stream (f32)
    kmask = kmask_ref[0].astype(jnp.float32)    # (1, S) key mask: 1 valid, 0 pad
    pmask = pmask_ref[0].astype(jnp.float32)    # (S, 1) padding mask
    S, D = x.shape
    dk = D // num_heads
    nq = S // tq

    # ---------------- attention sub-block: LN -> MHA -> +x -> *pmask ---------
    h = _layer_norm(x, ln1_g_ref[...], ln1_b_ref[...])

    # fused QKV projection: single MXU pass (log2(e)/sqrt(dk) pre-folded into Wq/bq)
    qkv = jnp.dot(h.astype(jnp.bfloat16), wqkv_ref[...],
                  preferred_element_type=jnp.float32) + bqkv_ref[...]   # (S, 3D)
    q_scr[...] = qkv[:, :D]                     # chunk-sliced via the scratch ref below
    k_bf = qkv[:, D:2 * D].astype(jnp.bfloat16)
    v_bf = qkv[:, 2 * D:].astype(jnp.bfloat16)

    # additive key-mask bias, hoisted out of the head/chunk loops (f32)
    bias = (kmask - 1.0) * 1e9                  # (1, S): 0 valid, -1e9 padded

    # query-chunked attention: live state bounded to (tq, S) per head.
    def q_chunk(qi, carry):
        qs = pl.multiple_of(qi * tq, tq)
        qc = q_scr[pl.ds(qs, tq), :].astype(jnp.bfloat16)     # (tq, D), pre-scaled
        for hh in range(num_heads):             # static unroll over heads (small)
            lo = hh * dk
            s = jnp.einsum('qd,kd->qk', qc[:, lo:lo + dk], k_bf[:, lo:lo + dk],
                           preferred_element_type=jnp.float32) + bias   # (tq, S)
            s = s - jnp.max(s, axis=-1, keepdims=True)
            p = jnp.exp2(s)                     # log2(e) folded into q on host
            r = pl.reciprocal(jnp.sum(p, axis=-1, keepdims=True), approx=True)
            ctx = jnp.dot(p.astype(jnp.bfloat16), v_bf[:, lo:lo + dk],
                          preferred_element_type=jnp.float32)           # (tq, dk)
            # normalize the small (tq, dk) context, not the (tq, S) probabilities,
            # and place it at its row/lane slot (no head concat / repack).
            ctx_scr[pl.ds(qs, tq), lo:lo + dk] = ctx * r
        return carry

    jax.lax.fori_loop(0, nq, q_chunk, 0)

    # single K=D output projection: fills the MXU, no per-head accumulate chain.
    attn = jnp.dot(ctx_scr[...].astype(jnp.bfloat16), wo_ref[...],
                   preferred_element_type=jnp.float32) + bo_ref[...]    # (S, D)
    out1 = (attn + x) * pmask                   # dropout==identity, residual, mask

    # ---------------- PosConvFF sub-block: LN -> conv -> ReLU -> conv -> +res -> *pmask
    h2 = _layer_norm(out1, ln2_g_ref[...], ln2_b_ref[...])
    Hd = w1_ref.shape[2]                        # d_inner
    shift_masks = _make_shift_masks(S, [padding - t for t in range(ksize)])

    # conv1: d_model -> d_inner, 'same' padding via shifted-row matmuls
    acc1 = jnp.zeros((S, Hd), jnp.float32)
    for tap in range(ksize):                    # static unroll over taps
        sh = padding - tap
        win = _shifted_rows(h2, sh, shift_masks[sh])
        acc1 = acc1 + jnp.dot(win.astype(jnp.bfloat16), w1_ref[tap],
                              preferred_element_type=jnp.float32)
    hidden = jnp.maximum(acc1 + b1_ref[...], 0.0)   # ReLU

    # conv2: d_inner -> d_model
    acc2 = jnp.zeros((S, D), jnp.float32)
    for tap in range(ksize):
        sh = padding - tap
        win = _shifted_rows(hidden, sh, shift_masks[sh])
        acc2 = acc2 + jnp.dot(win.astype(jnp.bfloat16), w2_ref[tap],
                              preferred_element_type=jnp.float32)

    out2 = (acc2 + b2_ref[...] + out1) * pmask
    o_ref[0] = out2.astype(o_ref.dtype)


# ---------------------------------------------------------------------------
# pallas_call wrapper
# ---------------------------------------------------------------------------
def _weight_spec():
    # Whole-array, VMEM-resident, outside the grid pipeline => single copy in VMEM
    # (grid-invariant weights would otherwise be double-buffered by default).
    return pl.BlockSpec(memory_space=_MS.VMEM)


def _vmem_limit_bytes():
    # 3/4 of physical VMEM: ~96 MiB on v5e/v6e (128 MiB), ~48 MiB on v7x (64 MiB).
    try:
        cap = int(pltpu.get_tpu_info().vmem_capacity_bytes)
        return (cap * 3) // 4
    except Exception:
        return None   # fall back to compiler default


def _prepare_layer_params(p, num_heads):
    """Host-side: fuse QKV, fold log2(e)/sqrt(dk) into Wq/bq (exp2 softmax in-kernel),
    cast matmul weights to bf16 (fold happens before the cast)."""
    d_model = p["wq"].shape[0]
    dk = d_model // num_heads
    scale = LOG2E / math.sqrt(dk)
    wqkv = jnp.concatenate([p["wq"] * scale, p["wk"], p["wv"]], axis=1)
    bqkv = jnp.concatenate([p["bq"] * scale, p["bk"], p["bv"]], axis=1)
    return (
        p["attn_ln_g"], p["attn_ln_b"],
        wqkv.astype(jnp.bfloat16), bqkv.astype(jnp.float32),
        p["wo"].astype(jnp.bfloat16), p["bo"].astype(jnp.float32),
        p["ff_ln_g"], p["ff_ln_b"],
        p["w1"].astype(jnp.bfloat16), p["b1"].astype(jnp.float32),
        p["w2"].astype(jnp.bfloat16), p["b2"].astype(jnp.float32),
    )


def _fft_layer(x, kmask, pmask, prepped, num_heads, ksize, padding, vmem_limit):
    B, S, D = x.shape
    Hd = prepped[8].shape[2]                    # w1: (K, D, Hd)
    tq = _choose_tq(S)
    kern = functools.partial(_fft_layer_kernel, num_heads=num_heads,
                             ksize=ksize, padding=padding, tq=tq)

    in_specs = [
        pl.BlockSpec((1, S, D), lambda b: (b, 0, 0)),   # x
        pl.BlockSpec((1, 1, S), lambda b: (b, 0, 0)),   # key mask
        pl.BlockSpec((1, S, 1), lambda b: (b, 0, 0)),   # padding mask
    ] + [_weight_spec() for _ in prepped]

    # advisory scheduling hints for XLA around the custom call
    flops = 2 * B * S * (4 * D * D + 2 * S * D + 2 * ksize * D * Hd)
    transcendentals = B * num_heads * S * S + 2 * B * S
    bytes_accessed = (2 * B * S * D * x.dtype.itemsize
                      + 2 * B * S * 4
                      + sum(int(a.size) * a.dtype.itemsize for a in prepped))
    cost = pl.CostEstimate(flops=int(flops), transcendentals=int(transcendentals),
                           bytes_accessed=int(bytes_accessed))

    return pl.pallas_call(
        kern,
        out_shape=jax.ShapeDtypeStruct((B, S, D), x.dtype),
        grid=(B,),
        in_specs=in_specs,
        out_specs=pl.BlockSpec((1, S, D), lambda b: (b, 0, 0)),
        scratch_shapes=[pltpu.VMEM((S, D), jnp.float32),    # q (pre-scaled)
                        pltpu.VMEM((S, D), jnp.float32)],   # per-head context slots
        compiler_params=pltpu.CompilerParams(
            dimension_semantics=("parallel",),   # B >= 2 keeps both v7x TCs busy
            vmem_limit_bytes=vmem_limit),
        cost_estimate=cost,
    )(x, kmask, pmask, *prepped)


def fftransformer_forward(x, mask, layer_params, num_heads, kernel):
    """x: (B, S, D), mask: (B, S) (1 = valid, 0 = pad)."""
    B, S, D = x.shape
    assert D % num_heads == 0
    assert kernel % 2 == 1, "use odd kernel for 'same' padding"
    padding = (kernel - 1) // 2
    assert S > padding, "sequence must be longer than the conv half-width"
    kmask = mask.reshape(B, 1, S).astype(jnp.float32)
    pmask = mask.reshape(B, S, 1).astype(jnp.float32)
    vmem_limit = _vmem_limit_bytes()
    for p in layer_params:
        prepped = _prepare_layer_params(p, num_heads)
        x = _fft_layer(x, kmask, pmask, prepped, num_heads, kernel, padding,
                       vmem_limit)
    return x


# ---------------------------------------------------------------------------
# deterministic synthetic parameter initialization
# ---------------------------------------------------------------------------
def init_fftransformer_params(key, num_layers, d_model, num_heads, hidden, kernel):
    assert d_model % num_heads == 0
    assert kernel % 2 == 1, "use odd kernel for 'same' padding"
    params = []
    for _ in range(num_layers):
        key, *ks = jax.random.split(key, 8)

        def nrm(k, shape, fan_in):
            return (jax.random.normal(k, shape, jnp.float32)
                    * (1.0 / math.sqrt(fan_in))).astype(jnp.float32)

        p = dict(
            # attention sub-block
            attn_ln_g=jnp.ones((1, d_model), jnp.float32),
            attn_ln_b=jnp.zeros((1, d_model), jnp.float32),
            wq=nrm(ks[0], (d_model, d_model), d_model),   # stored as (in, out)
            bq=jnp.zeros((1, d_model), jnp.float32),
            wk=nrm(ks[1], (d_model, d_model), d_model),
            bk=jnp.zeros((1, d_model), jnp.float32),
            wv=nrm(ks[2], (d_model, d_model), d_model),
            bv=jnp.zeros((1, d_model), jnp.float32),
            wo=nrm(ks[3], (d_model, d_model), d_model),
            bo=jnp.zeros((1, d_model), jnp.float32),
            # position-wise conv FF sub-block
            ff_ln_g=jnp.ones((1, d_model), jnp.float32),
            ff_ln_b=jnp.zeros((1, d_model), jnp.float32),
            # conv weights stored as (K, C_in, C_out) so kernel does win @ w[tap]
            w1=nrm(ks[4], (kernel, d_model, hidden), d_model * kernel),
            b1=jnp.zeros((1, hidden), jnp.float32),
            w2=nrm(ks[5], (kernel, hidden, d_model), hidden * kernel),
            b2=jnp.zeros((1, d_model), jnp.float32),
        )
        params.append(p)
    return params


# ---------------------------------------------------------------------------
if __name__ == "__main__":
    # small, module-consistent shapes
    B, S = 2, 8
    num_layers, d_model, num_heads, hidden, kernel = 2, 32, 2, 64, 3

    key = jax.random.PRNGKey(0)
    kx, kp = jax.random.split(key)
    x = jax.random.normal(kx, (B, S, d_model), jnp.float32)
    lengths = jnp.array([S, S - 2])
    mask = (jnp.arange(S)[None, :] < lengths[:, None]).astype(jnp.float32)  # (B, S)

    params = init_fftransformer_params(kp, num_layers, d_model, num_heads,
                                       hidden, kernel)

    out = fftransformer_forward(x, mask, params, num_heads, kernel)
    out = jax.block_until_ready(out)
    assert out.shape == (B, S, d_model)
    assert bool(jnp.all(jnp.isfinite(out)))
    print("KERNEL_OK")
</pallas_src>

<mosaic_0001>
module attributes {stable_mosaic.version = 11 : i64} {
  func.func @_fft_layer_kernel(%arg0: i32, %arg1: memref<1x8x32xf32, #tpu.memory_space<vmem>>, %arg2: memref<1x1x8xf32, #tpu.memory_space<vmem>>, %arg3: memref<1x8x1xf32, #tpu.memory_space<vmem>>, %arg4: memref<1x32xf32, #tpu.memory_space<vmem>>, %arg5: memref<1x32xf32, #tpu.memory_space<vmem>>, %arg6: memref<32x96xbf16, #tpu.memory_space<vmem>>, %arg7: memref<1x96xf32, #tpu.memory_space<vmem>>, %arg8: memref<32x32xbf16, #tpu.memory_space<vmem>>, %arg9: memref<1x32xf32, #tpu.memory_space<vmem>>, %arg10: memref<1x32xf32, #tpu.memory_space<vmem>>, %arg11: memref<1x32xf32, #tpu.memory_space<vmem>>, %arg12: memref<3x32x64xbf16, #tpu.memory_space<vmem>>, %arg13: memref<1x64xf32, #tpu.memory_space<vmem>>, %arg14: memref<3x64x32xbf16, #tpu.memory_space<vmem>>, %arg15: memref<1x32xf32, #tpu.memory_space<vmem>>, %arg16: memref<1x8x32xf32, #tpu.memory_space<vmem>>, %arg17: memref<8x32xf32, #tpu.memory_space<vmem>>, %arg18: memref<8x32xf32, #tpu.memory_space<vmem>>) attributes {dimension_semantics = [#tpu.dimension_semantics<parallel>], iteration_bounds = array<i64: 2>, scalar_prefetch = 0 : i64, scratch_operands = 2 : i64, tpu.core_type = #tpu.core_type<tc>, window_params = [{transform_indices = @transform_0, window_bounds = array<i64: 1, 8, 32>}, {transform_indices = @transform_1, window_bounds = array<i64: 1, 1, 8>}, {transform_indices = @transform_2, window_bounds = array<i64: 1, 8, 1>}, {pipeline_mode = #tpu.pipeline_mode<synchronous>, transform_indices = @transform_3, window_bounds = array<i64: 1, 32>}, {pipeline_mode = #tpu.pipeline_mode<synchronous>, transform_indices = @transform_4, window_bounds = array<i64: 1, 32>}, {pipeline_mode = #tpu.pipeline_mode<synchronous>, transform_indices = @transform_5, window_bounds = array<i64: 32, 96>}, {pipeline_mode = #tpu.pipeline_mode<synchronous>, transform_indices = @transform_6, window_bounds = array<i64: 1, 96>}, {pipeline_mode = #tpu.pipeline_mode<synchronous>, transform_indices = @transform_7, window_bounds = array<i64: 32, 32>}, {pipeline_mode = #tpu.pipeline_mode<synchronous>, transform_indices = @transform_8, window_bounds = array<i64: 1, 32>}, {pipeline_mode = #tpu.pipeline_mode<synchronous>, transform_indices = @transform_9, window_bounds = array<i64: 1, 32>}, {pipeline_mode = #tpu.pipeline_mode<synchronous>, transform_indices = @transform_10, window_bounds = array<i64: 1, 32>}, {pipeline_mode = #tpu.pipeline_mode<synchronous>, transform_indices = @transform_11, window_bounds = array<i64: 3, 32, 64>}, {pipeline_mode = #tpu.pipeline_mode<synchronous>, transform_indices = @transform_12, window_bounds = array<i64: 1, 64>}, {pipeline_mode = #tpu.pipeline_mode<synchronous>, transform_indices = @transform_13, window_bounds = array<i64: 3, 64, 32>}, {pipeline_mode = #tpu.pipeline_mode<synchronous>, transform_indices = @transform_14, window_bounds = array<i64: 1, 32>}, {transform_indices = @transform_15, window_bounds = array<i64: 1, 8, 32>}]} {
    %c0 = arith.constant 0 : index
    %c0_0 = arith.constant 0 : index
    %c0_1 = arith.constant 0 : index
    %0 = vector.load %arg1[%c0, %c0_0, %c0_1] : memref<1x8x32xf32, #tpu.memory_space<vmem>>, vector<1x8x32xf32>
    %1 = vector.shape_cast %0 : vector<1x8x32xf32> to vector<8x32xf32>
    %c0_2 = arith.constant 0 : index
    %c0_3 = arith.constant 0 : index
    %c0_4 = arith.constant 0 : index
    %2 = vector.load %arg2[%c0_2, %c0_3, %c0_4] : memref<1x1x8xf32, #tpu.memory_space<vmem>>, vector<1x1x8xf32>
    %3 = vector.shape_cast %2 : vector<1x1x8xf32> to vector<1x8xf32>
    %c0_5 = arith.constant 0 : index
    %c0_6 = arith.constant 0 : index
    %c0_7 = arith.constant 0 : index
    %4 = vector.load %arg3[%c0_5, %c0_6, %c0_7] : memref<1x8x1xf32, #tpu.memory_space<vmem>>, vector<1x8x1xf32>
    %5 = vector.shape_cast %4 : vector<1x8x1xf32> to vector<8x1xf32>
    %c0_8 = arith.constant 0 : index
    %c0_9 = arith.constant 0 : index
    %6 = vector.load %arg4[%c0_8, %c0_9] : memref<1x32xf32, #tpu.memory_space<vmem>>, vector<1x32xf32>
    %c0_10 = arith.constant 0 : index
    %c0_11 = arith.constant 0 : index
    %7 = vector.load %arg5[%c0_10, %c0_11] : memref<1x32xf32, #tpu.memory_space<vmem>>, vector<1x32xf32>
    %cst = arith.constant dense<0.000000e+00> : vector<8xf32>
    %8 = vector.multi_reduction <add>, %1, %cst [1] : vector<8x32xf32> to vector<8xf32>
    %9 = vector.shape_cast %8 : vector<8xf32> to vector<8x1xf32>
    %cst_12 = arith.constant 3.200000e+01 : f32
    %10 = vector.broadcast %cst_12 : f32 to vector<8x1xf32>
    %11 = arith.divf %9, %10 : vector<8x1xf32>
    %12 = vector.broadcast %11 : vector<8x1xf32> to vector<8x32xf32>
    %13 = arith.subf %1, %12 : vector<8x32xf32>
    %14 = arith.mulf %13, %13 : vector<8x32xf32>
    %cst_13 = arith.constant dense<0.000000e+00> : vector<8xf32>
    %15 = vector.multi_reduction <add>, %14, %cst_13 [1] : vector<8x32xf32> to vector<8xf32>
    %16 = vector.shape_cast %15 : vector<8xf32> to vector<8x1xf32>
    %cst_14 = arith.constant 3.200000e+01 : f32
    %17 = vector.broadcast %cst_14 : f32 to vector<8x1xf32>
    %18 = arith.divf %16, %17 : vector<8x1xf32>
    %19 = vector.broadcast %11 : vector<8x1xf32> to vector<8x32xf32>
    %20 = arith.subf %1, %19 : vector<8x32xf32>
    %cst_15 = arith.constant 9.99999974E-6 : f32
    %21 = vector.broadcast %cst_15 : f32 to vector<8x1xf32>
    %22 = arith.addf %18, %21 : vector<8x1xf32>
    %23 = math.rsqrt %22 : vector<8x1xf32>
    %24 = vector.broadcast %23 : vector<8x1xf32> to vector<8x32xf32>
    %25 = arith.mulf %20, %24 : vector<8x32xf32>
    %26 = vector.broadcast %6 : vector<1x32xf32> to vector<8x32xf32>
    %27 = arith.mulf %25, %26 : vector<8x32xf32>
    %28 = vector.broadcast %7 : vector<1x32xf32> to vector<8x32xf32>
    %29 = arith.addf %27, %28 : vector<8x32xf32>
    %30 = arith.truncf %29 : vector<8x32xf32> to vector<8x32xbf16>
    %c0_16 = arith.constant 0 : index
    %c0_17 = arith.constant 0 : index
    %31 = vector.load %arg6[%c0_16, %c0_17] : memref<32x96xbf16, #tpu.memory_space<vmem>>, vector<32x96xbf16>
    %cst_18 = arith.constant dense<0.000000e+00> : vector<8x96xf32>
    %32 = tpu.matmul %30, %31, %cst_18 {dimension_numbers = #tpu.dot_dimension_numbers<[1], [0], [0], [1], [0, 0, 1, 1], [], []>} : vector<8x32xbf16>, vector<32x96xbf16>, vector<8x96xf32> -> vector<8x96xf32>
    %c0_19 = arith.constant 0 : index
    %c0_20 = arith.constant 0 : index
    %33 = vector.load %arg7[%c0_19, %c0_20] : memref<1x96xf32, #tpu.memory_space<vmem>>, vector<1x96xf32>
    %34 = vector.broadcast %33 : vector<1x96xf32> to vector<8x96xf32>
    %35 = arith.addf %32, %34 : vector<8x96xf32>
    %36 = vector.extract_strided_slice %35 {offsets = [0, 0], sizes = [8, 32], strides = [1, 1]} : vector<8x96xf32> to vector<8x32xf32>
    %c0_21 = arith.constant 0 : index
    %c0_22 = arith.constant 0 : index
    %37 = vector.load %arg17[%c0_21, %c0_22] : memref<8x32xf32, #tpu.memory_space<vmem>>, vector<8x32xf32>
    tpu.vector_store %arg17[%c0_21, %c0_22], %36 {strides = array<i32>} : memref<8x32xf32, #tpu.memory_space<vmem>>, vector<8x32xf32>,
    %38 = vector.extract_strided_slice %35 {offsets = [0, 32], sizes = [8, 32], strides = [1, 1]} : vector<8x96xf32> to vector<8x32xf32>
    %39 = arith.truncf %38 : vector<8x32xf32> to vector<8x32xbf16>
    %40 = vector.extract_strided_slice %35 {offsets = [0, 64], sizes = [8, 32], strides = [1, 1]} : vector<8x96xf32> to vector<8x32xf32>
    %41 = arith.truncf %40 : vector<8x32xf32> to vector<8x32xbf16>
    %cst_23 = arith.constant 1.000000e+00 : f32
    %42 = vector.broadcast %cst_23 : f32 to vector<1x8xf32>
    %43 = arith.subf %3, %42 : vector<1x8xf32>
    %cst_24 = arith.constant 1.000000e+09 : f32
    %44 = vector.broadcast %cst_24 : f32 to vector<1x8xf32>
    %45 = arith.mulf %43, %44 : vector<1x8xf32>
    %c0_i32 = arith.constant 0 : i32
    %c8_i32 = arith.constant 8 : i32
    %46 = arith.muli %c0_i32, %c8_i32 : i32
    %47 = tpu.assume_multiple %46, 8 : i32
    %48 = arith.index_cast %47 : i32 to index
    %c0_25 = arith.constant 0 : index
    %49 = vector.load %arg17[%48, %c0_25] : memref<8x32xf32, #tpu.memory_space<vmem>>, vector<8x32xf32>
    %50 = arith.truncf %49 : vector<8x32xf32> to vector<8x32xbf16>
    %51 = vector.extract_strided_slice %50 {offsets = [0, 0], sizes = [8, 16], strides = [1, 1]} : vector<8x32xbf16> to vector<8x16xbf16>
    %52 = vector.extract_strided_slice %39 {offsets = [0, 0], sizes = [8, 16], strides = [1, 1]} : vector<8x32xbf16> to vector<8x16xbf16>
    "tpu.trace_start"() <{level = 10 : i32, message = "qd,kd->qk"}> : () -> ()
    %cst_26 = arith.constant dense<0.000000e+00> : vector<8x8xf32>
    %53 = tpu.matmul %51, %52, %cst_26 {dimension_numbers = #tpu.dot_dimension_numbers<[1], [1], [0], [0], [0, 0, 1, 0], [], []>} : vector<8x16xbf16>, vector<8x16xbf16>, vector<8x8xf32> -> vector<8x8xf32>
    "tpu.trace_stop"() : () -> ()
    %54 = vector.broadcast %45 : vector<1x8xf32> to vector<8x8xf32>
    %55 = arith.addf %53, %54 : vector<8x8xf32>
    %cst_27 = arith.constant dense<0xFF800000> : vector<8xf32>
    %56 = vector.multi_reduction <maximumf>, %55, %cst_27 [1] : vector<8x8xf32> to vector<8xf32>
    %57 = vector.shape_cast %56 : vector<8xf32> to vector<8x1xf32>
    %58 = vector.broadcast %57 : vector<8x1xf32> to vector<8x8xf32>
    %59 = arith.subf %55, %58 : vector<8x8xf32>
    %60 = math.exp2 %59 : vector<8x8xf32>
    %cst_28 = arith.constant dense<0.000000e+00> : vector<8xf32>
    %61 = vector.multi_reduction <add>, %60, %cst_28 [1] : vector<8x8xf32> to vector<8xf32>
    %62 = vector.shape_cast %61 : vector<8xf32> to vector<8x1xf32>
    %63 = tpu.reciprocal %62 {approx = true} : vector<8x1xf32> -> vector<8x1xf32>
    %64 = arith.truncf %60 : vector<8x8xf32> to vector<8x8xbf16>
    %65 = vector.extract_strided_slice %41 {offsets = [0, 0], sizes = [8, 16], strides = [1, 1]} : vector<8x32xbf16> to vector<8x16xbf16>
    %cst_29 = arith.constant dense<0.000000e+00> : vector<8x16xf32>
    %66 = tpu.matmul %64, %65, %cst_29 {dimension_numbers = #tpu.dot_dimension_numbers<[1], [0], [0], [1], [0, 0, 1, 1], [], []>} : vector<8x8xbf16>, vector<8x16xbf16>, vector<8x16xf32> -> vector<8x16xf32>
    %67 = vector.broadcast %63 : vector<8x1xf32> to vector<8x16xf32>
    %68 = arith.mulf %66, %67 : vector<8x16xf32>
    %69 = arith.index_cast %47 : i32 to index
    %c0_30 = arith.constant 0 : index
    %70 = vector.load %arg18[%69, %c0_30] : memref<8x32xf32, #tpu.memory_space<vmem>>, vector<8x16xf32>
    tpu.vector_store %arg18[%69, %c0_30], %68 {strides = array<i32>} : memref<8x32xf32, #tpu.memory_space<vmem>>, vector<8x16xf32>,
    %71 = vector.extract_strided_slice %50 {offsets = [0, 16], sizes = [8, 16], strides = [1, 1]} : vector<8x32xbf16> to vector<8x16xbf16>
    %72 = vector.extract_strided_slice %39 {offsets = [0, 16], sizes = [8, 16], strides = [1, 1]} : vector<8x32xbf16> to vector<8x16xbf16>
    "tpu.trace_start"() <{level = 10 : i32, message = "qd,kd->qk"}> : () -> ()
    %cst_31 = arith.constant dense<0.000000e+00> : vector<8x8xf32>
    %73 = tpu.matmul %71, %72, %cst_31 {dimension_numbers = #tpu.dot_dimension_numbers<[1], [1], [0], [0], [0, 0, 1, 0], [], []>} : vector<8x16xbf16>, vector<8x16xbf16>, vector<8x8xf32> -> vector<8x8xf32>
    "tpu.trace_stop"() : () -> ()
    %74 = vector.broadcast %45 : vector<1x8xf32> to vector<8x8xf32>
    %75 = arith.addf %73, %74 : vector<8x8xf32>
    %cst_32 = arith.constant dense<0xFF800000> : vector<8xf32>
    %76 = vector.multi_reduction <maximumf>, %75, %cst_32 [1] : vector<8x8xf32> to vector<8xf32>
    %77 = vector.shape_cast %76 : vector<8xf32> to vector<8x1xf32>
    %78 = vector.broadcast %77 : vector<8x1xf32> to vector<8x8xf32>
    %79 = arith.subf %75, %78 : vector<8x8xf32>
    %80 = math.exp2 %79 : vector<8x8xf32>
    %cst_33 = arith.constant dense<0.000000e+00> : vector<8xf32>
    %81 = vector.multi_reduction <add>, %80, %cst_33 [1] : vector<8x8xf32> to vector<8xf32>
    %82 = vector.shape_cast %81 : vector<8xf32> to vector<8x1xf32>
    %83 = tpu.reciprocal %82 {approx = true} : vector<8x1xf32> -> vector<8x1xf32>
    %84 = arith.truncf %80 : vector<8x8xf32> to vector<8x8xbf16>
    %85 = vector.extract_strided_slice %41 {offsets = [0, 16], sizes = [8, 16], strides = [1, 1]} : vector<8x32xbf16> to vector<8x16xbf16>
    %cst_34 = arith.constant dense<0.000000e+00> : vector<8x16xf32>
    %86 = tpu.matmul %84, %85, %cst_34 {dimension_numbers = #tpu.dot_dimension_numbers<[1], [0], [0], [1], [0, 0, 1, 1], [], []>} : vector<8x8xbf16>, vector<8x16xbf16>, vector<8x16xf32> -> vector<8x16xf32>
    %87 = vector.broadcast %83 : vector<8x1xf32> to vector<8x16xf32>
    %88 = arith.mulf %86, %87 : vector<8x16xf32>
    %89 = arith.index_cast %47 : i32 to index
    %c16 = arith.constant 16 : index
    %90 = vector.load %arg18[%89, %c16] : memref<8x32xf32, #tpu.memory_space<vmem>>, vector<8x16xf32>
    tpu.vector_store %arg18[%89, %c16], %88 {strides = array<i32>} : memref<8x32xf32, #tpu.memory_space<vmem>>, vector<8x16xf32>,
    %c1_i32 = arith.constant 1 : i32
    %c0_35 = arith.constant 0 : index
    %c0_36 = arith.constant 0 : index
    %91 = vector.load %arg18[%c0_35, %c0_36] : memref<8x32xf32, #tpu.memory_space<vmem>>, vector<8x32xf32>
    %92 = arith.truncf %91 : vector<8x32xf32> to vector<8x32xbf16>
    %c0_37 = arith.constant 0 : index
    %c0_38 = arith.constant 0 : index
    %93 = vector.load %arg8[%c0_37, %c0_38] : memref<32x32xbf16, #tpu.memory_space<vmem>>, vector<32x32xbf16>
    %cst_39 = arith.constant dense<0.000000e+00> : vector<8x32xf32>
    %94 = tpu.matmul %92, %93, %cst_39 {dimension_numbers = #tpu.dot_dimension_numbers<[1], [0], [0], [1], [0, 0, 1, 1], [], []>} : vector<8x32xbf16>, vector<32x32xbf16>, vector<8x32xf32> -> vector<8x32xf32>
    %c0_40 = arith.constant 0 : index
    %c0_41 = arith.constant 0 : index
    %95 = vector.load %arg9[%c0_40, %c0_41] : memref<1x32xf32, #tpu.memory_space<vmem>>, vector<1x32xf32>
    %96 = vector.broadcast %95 : vector<1x32xf32> to vector<8x32xf32>
    %97 = arith.addf %94, %96 : vector<8x32xf32>
    %98 = arith.addf %97, %1 : vector<8x32xf32>
    %99 = vector.broadcast %5 : vector<8x1xf32> to vector<8x32xf32>
    %100 = arith.mulf %98, %99 : vector<8x32xf32>
    %c0_42 = arith.constant 0 : index
    %c0_43 = arith.constant 0 : index
    %101 = vector.load %arg10[%c0_42, %c0_43] : memref<1x32xf32, #tpu.memory_space<vmem>>, vector<1x32xf32>
    %c0_44 = arith.constant 0 : index
    %c0_45 = arith.constant 0 : index
    %102 = vector.load %arg11[%c0_44, %c0_45] : memref<1x32xf32, #tpu.memory_space<vmem>>, vector<1x32xf32>
    %cst_46 = arith.constant dense<0.000000e+00> : vector<8xf32>
    %103 = vector.multi_reduction <add>, %100, %cst_46 [1] : vector<8x32xf32> to vector<8xf32>
    %104 = vector.shape_cast %103 : vector<8xf32> to vector<8x1xf32>
    %cst_47 = arith.constant 3.200000e+01 : f32
    %105 = vector.broadcast %cst_47 : f32 to vector<8x1xf32>
    %106 = arith.divf %104, %105 : vector<8x1xf32>
    %107 = vector.broadcast %106 : vector<8x1xf32> to vector<8x32xf32>
    %108 = arith.subf %100, %107 : vector<8x32xf32>
    %109 = arith.mulf %108, %108 : vector<8x32xf32>
    %cst_48 = arith.constant dense<0.000000e+00> : vector<8xf32>
    %110 = vector.multi_reduction <add>, %109, %cst_48 [1] : vector<8x32xf32> to vector<8xf32>
    %111 = vector.shape_cast %110 : vector<8xf32> to vector<8x1xf32>
    %cst_49 = arith.constant 3.200000e+01 : f32
    %112 = vector.broadcast %cst_49 : f32 to vector<8x1xf32>
    %113 = arith.divf %111, %112 : vector<8x1xf32>
    %114 = vector.broadcast %106 : vector<8x1xf32> to vector<8x32xf32>
    %115 = arith.subf %100, %114 : vector<8x32xf32>
    %cst_50 = arith.constant 9.99999974E-6 : f32
    %116 = vector.broadcast %cst_50 : f32 to vector<8x1xf32>
    %117 = arith.addf %113, %116 : vector<8x1xf32>
    %118 = math.rsqrt %117 : vector<8x1xf32>
    %119 = vector.broadcast %118 : vector<8x1xf32> to vector<8x32xf32>
    %120 = arith.mulf %115, %119 : vector<8x32xf32>
    %121 = vector.broadcast %101 : vector<1x32xf32> to vector<8x32xf32>
    %122 = arith.mulf %120, %121 : vector<8x32xf32>
    %123 = vector.broadcast %102 : vector<1x32xf32> to vector<8x32xf32>
    %124 = arith.addf %122, %123 : vector<8x32xf32>
    %125 = tpu.iota {dimensions = array<i32: 0>} : vector<8x1xi32>
    %c1_i32_51 = arith.constant 1 : i32
    %126 = vector.broadcast %c1_i32_51 : i32 to vector<8x1xi32>
    %127 = arith.cmpi sge, %125, %126 : vector<8x1xi32>
    %c7_i32 = arith.constant 7 : i32
    %128 = vector.broadcast %c7_i32 : i32 to vector<8x1xi32>
    %129 = arith.cmpi slt, %125, %128 : vector<8x1xi32>
    %cst_52 = arith.constant 0.000000e+00 : f32
    %130 = vector.broadcast %cst_52 : f32 to vector<8x64xf32>
    %c1_i32_53 = arith.constant 1 : i32
    %131 = tpu.dynamic_rotate %124 by %c1_i32_53 dim 0 : vector<8x32xf32>, i32 -> vector<8x32xf32>
    %cst_54 = arith.constant 0.000000e+00 : f32
    %132 = vector.broadcast %cst_54 : f32 to vector<8x32xf32>
    %133 = vector.shape_cast %127 : vector<8x1xi1> to vector<8x1xi1>
    %134 = vector.broadcast %133 : vector<8x1xi1> to vector<8x32xi1>
    %135 = arith.select %134, %131, %132 : vector<8x32xi1>, vector<8x32xf32>
    %136 = arith.truncf %135 : vector<8x32xf32> to vector<8x32xbf16>
    %c0_55 = arith.constant 0 : index
    %c0_56 = arith.constant 0 : index
    %c0_57 = arith.constant 0 : index
    %137 = vector.load %arg12[%c0_55, %c0_56, %c0_57] : memref<3x32x64xbf16, #tpu.memory_space<vmem>>, vector<1x32x64xbf16>
    %138 = vector.shape_cast %137 : vector<1x32x64xbf16> to vector<32x64xbf16>
    %cst_58 = arith.constant dense<0.000000e+00> : vector<8x64xf32>
    %139 = tpu.matmul %136, %138, %cst_58 {dimension_numbers = #tpu.dot_dimension_numbers<[1], [0], [0], [1], [0, 0, 1, 1], [], []>} : vector<8x32xbf16>, vector<32x64xbf16>, vector<8x64xf32> -> vector<8x64xf32>
    %140 = arith.addf %130, %139 : vector<8x64xf32>
    %141 = arith.truncf %124 : vector<8x32xf32> to vector<8x32xbf16>
    %c1 = arith.constant 1 : index
    %c0_59 = arith.constant 0 : index
    %c0_60 = arith.constant 0 : index
    %142 = vector.load %arg12[%c1, %c0_59, %c0_60] : memref<3x32x64xbf16, #tpu.memory_space<vmem>>, vector<1x32x64xbf16>
    %143 = vector.shape_cast %142 : vector<1x32x64xbf16> to vector<32x64xbf16>
    %cst_61 = arith.constant dense<0.000000e+00> : vector<8x64xf32>
    %144 = tpu.matmul %141, %143, %cst_61 {dimension_numbers = #tpu.dot_dimension_numbers<[1], [0], [0], [1], [0, 0, 1, 1], [], []>} : vector<8x32xbf16>, vector<32x64xbf16>, vector<8x64xf32> -> vector<8x64xf32>
    %145 = arith.addf %140, %144 : vector<8x64xf32>
    %c7_i32_62 = arith.constant 7 : i32
    %146 = tpu.dynamic_rotate %124 by %c7_i32_62 dim 0 : vector<8x32xf32>, i32 -> vector<8x32xf32>
    %cst_63 = arith.constant 0.000000e+00 : f32
    %147 = vector.broadcast %cst_63 : f32 to vector<8x32xf32>
    %148 = vector.shape_cast %129 : vector<8x1xi1> to vector<8x1xi1>
    %149 = vector.broadcast %148 : vector<8x1xi1> to vector<8x32xi1>
    %150 = arith.select %149, %146, %147 : vector<8x32xi1>, vector<8x32xf32>
    %151 = arith.truncf %150 : vector<8x32xf32> to vector<8x32xbf16>
    %c2 = arith.constant 2 : index
    %c0_64 = arith.constant 0 : index
    %c0_65 = arith.constant 0 : index
    %152 = vector.load %arg12[%c2, %c0_64, %c0_65] : memref<3x32x64xbf16, #tpu.memory_space<vmem>>, vector<1x32x64xbf16>
    %153 = vector.shape_cast %152 : vector<1x32x64xbf16> to vector<32x64xbf16>
    %cst_66 = arith.constant dense<0.000000e+00> : vector<8x64xf32>
    %154 = tpu.matmul %151, %153, %cst_66 {dimension_numbers = #tpu.dot_dimension_numbers<[1], [0], [0], [1], [0, 0, 1, 1], [], []>} : vector<8x32xbf16>, vector<32x64xbf16>, vector<8x64xf32> -> vector<8x64xf32>
    %155 = arith.addf %145, %154 : vector<8x64xf32>
    %c0_67 = arith.constant 0 : index
    %c0_68 = arith.constant 0 : index
    %156 = vector.load %arg13[%c0_67, %c0_68] : memref<1x64xf32, #tpu.memory_space<vmem>>, vector<1x64xf32>
    %157 = vector.broadcast %156 : vector<1x64xf32> to vector<8x64xf32>
    %158 = arith.addf %155, %157 : vector<8x64xf32>
    %cst_69 = arith.constant 0.000000e+00 : f32
    %159 = vector.broadcast %cst_69 : f32 to vector<8x64xf32>
    %160 = arith.maximumf %158, %159 : vector<8x64xf32>
    %cst_70 = arith.constant 0.000000e+00 : f32
    %161 = vector.broadcast %cst_70 : f32 to vector<8x32xf32>
    %c1_i32_71 = arith.constant 1 : i32
    %162 = tpu.dynamic_rotate %160 by %c1_i32_71 dim 0 : vector<8x64xf32>, i32 -> vector<8x64xf32>
    %cst_72 = arith.constant 0.000000e+00 : f32
    %163 = vector.broadcast %cst_72 : f32 to vector<8x64xf32>
    %164 = vector.shape_cast %127 : vector<8x1xi1> to vector<8x1xi1>
    %165 = vector.broadcast %164 : vector<8x1xi1> to vector<8x64xi1>
    %166 = arith.select %165, %162, %163 : vector<8x64xi1>, vector<8x64xf32>
    %167 = arith.truncf %166 : vector<8x64xf32> to vector<8x64xbf16>
    %c0_73 = arith.constant 0 : index
    %c0_74 = arith.constant 0 : index
    %c0_75 = arith.constant 0 : index
    %168 = vector.load %arg14[%c0_73, %c0_74, %c0_75] : memref<3x64x32xbf16, #tpu.memory_space<vmem>>, vector<1x64x32xbf16>
    %169 = vector.shape_cast %168 : vector<1x64x32xbf16> to vector<64x32xbf16>
    %cst_76 = arith.constant dense<0.000000e+00> : vector<8x32xf32>
    %170 = tpu.matmul %167, %169, %cst_76 {dimension_numbers = #tpu.dot_dimension_numbers<[1], [0], [0], [1], [0, 0, 1, 1], [], []>} : vector<8x64xbf16>, vector<64x32xbf16>, vector<8x32xf32> -> vector<8x32xf32>
    %171 = arith.addf %161, %170 : vector<8x32xf32>
    %172 = arith.truncf %160 : vector<8x64xf32> to vector<8x64xbf16>
    %c1_77 = arith.constant 1 : index
    %c0_78 = arith.constant 0 : index
    %c0_79 = arith.constant 0 : index
    %173 = vector.load %arg14[%c1_77, %c0_78, %c0_79] : memref<3x64x32xbf16, #tpu.memory_space<vmem>>, vector<1x64x32xbf16>
    %174 = vector.shape_cast %173 : vector<1x64x32xbf16> to vector<64x32xbf16>
    %cst_80 = arith.constant dense<0.000000e+00> : vector<8x32xf32>
    %175 = tpu.matmul %172, %174, %cst_80 {dimension_numbers = #tpu.dot_dimension_numbers<[1], [0], [0], [1], [0, 0, 1, 1], [], []>} : vector<8x64xbf16>, vector<64x32xbf16>, vector<8x32xf32> -> vector<8x32xf32>
    %176 = arith.addf %171, %175 : vector<8x32xf32>
    %c7_i32_81 = arith.constant 7 : i32
    %177 = tpu.dynamic_rotate %160 by %c7_i32_81 dim 0 : vector<8x64xf32>, i32 -> vector<8x64xf32>
    %cst_82 = arith.constant 0.000000e+00 : f32
    %178 = vector.broadcast %cst_82 : f32 to vector<8x64xf32>
    %179 = vector.shape_cast %129 : vector<8x1xi1> to vector<8x1xi1>
    %180 = vector.broadcast %179 : vector<8x1xi1> to vector<8x64xi1>
    %181 = arith.select %180, %177, %178 : vector<8x64xi1>, vector<8x64xf32>
    %182 = arith.truncf %181 : vector<8x64xf32> to vector<8x64xbf16>
    %c2_83 = arith.constant 2 : index
    %c0_84 = arith.constant 0 : index
    %c0_85 = arith.constant 0 : index
    %183 = vector.load %arg14[%c2_83, %c0_84, %c0_85] : memref<3x64x32xbf16, #tpu.memory_space<vmem>>, vector<1x64x32xbf16>
    %184 = vector.shape_cast %183 : vector<1x64x32xbf16> to vector<64x32xbf16>
    %cst_86 = arith.constant dense<0.000000e+00> : vector<8x32xf32>
    %185 = tpu.matmul %182, %184, %cst_86 {dimension_numbers = #tpu.dot_dimension_numbers<[1], [0], [0], [1], [0, 0, 1, 1], [], []>} : vector<8x64xbf16>, vector<64x32xbf16>, vector<8x32xf32> -> vector<8x32xf32>
    %186 = arith.addf %176, %185 : vector<8x32xf32>
    %c0_87 = arith.constant 0 : index
    %c0_88 = arith.constant 0 : index
    %187 = vector.load %arg15[%c0_87, %c0_88] : memref<1x32xf32, #tpu.memory_space<vmem>>, vector<1x32xf32>
    %188 = vector.broadcast %187 : vector<1x32xf32> to vector<8x32xf32>
    %189 = arith.addf %186, %188 : vector<8x32xf32>
    %190 = arith.addf %189, %100 : vector<8x32xf32>
    %191 = vector.broadcast %5 : vector<8x1xf32> to vector<8x32xf32>
    %192 = arith.mulf %190, %191 : vector<8x32xf32>
    %c0_89 = arith.constant 0 : index
    %c0_90 = arith.constant 0 : index
    %c0_91 = arith.constant 0 : index
    %193 = vector.load %arg16[%c0_89, %c0_90, %c0_91] : memref<1x8x32xf32, #tpu.memory_space<vmem>>, vector<1x8x32xf32>
    %194 = vector.shape_cast %193 : vector<1x8x32xf32> to vector<8x32xf32>
    %195 = vector.shape_cast %192 : vector<8x32xf32> to vector<1x8x32xf32>
    tpu.vector_store %arg16[%c0_89, %c0_90, %c0_91], %195 {strides = array<i32>} : memref<1x8x32xf32, #tpu.memory_space<vmem>>, vector<1x8x32xf32>,
    return
  }
  func.func @transform_0(%arg0: i32) -> (i32, i32, i32) {
    %c0_i32 = arith.constant 0 : i32
    %c0_i32_0 = arith.constant 0 : i32
    %c0_i32_1 = arith.constant 0 : i32
    return %arg0, %c0_i32, %c0_i32_0 : i32, i32, i32
  }
  func.func @transform_1(%arg0: i32) -> (i32, i32, i32) {
    %c0_i32 = arith.constant 0 : i32
    %c0_i32_0 = arith.constant 0 : i32
    %c0_i32_1 = arith.constant 0 : i32
    return %arg0, %c0_i32, %c0_i32_0 : i32, i32, i32
  }
  func.func @transform_2(%arg0: i32) -> (i32, i32, i32) {
    %c0_i32 = arith.constant 0 : i32
    %c0_i32_0 = arith.constant 0 : i32
    %c0_i32_1 = arith.constant 0 : i32
    return %arg0, %c0_i32, %c0_i32_0 : i32, i32, i32
  }
  func.func @transform_3(%arg0: i32) -> (i32, i32) {
    %c0_i32 = arith.constant 0 : i32
    %c0_i32_0 = arith.constant 0 : i32
    %c0_i32_1 = arith.constant 0 : i32
    return %c0_i32, %c0_i32_0 : i32, i32
  }
  func.func @transform_4(%arg0: i32) -> (i32, i32) {
    %c0_i32 = arith.constant 0 : i32
    %c0_i32_0 = arith.constant 0 : i32
    %c0_i32_1 = arith.constant 0 : i32
    return %c0_i32, %c0_i32_0 : i32, i32
  }
  func.func @transform_5(%arg0: i32) -> (i32, i32) {
    %c0_i32 = arith.constant 0 : i32
    %c0_i32_0 = arith.constant 0 : i32
    %c0_i32_1 = arith.constant 0 : i32
    return %c0_i32, %c0_i32_0 : i32, i32
  }
  func.func @transform_6(%arg0: i32) -> (i32, i32) {
    %c0_i32 = arith.constant 0 : i32
    %c0_i32_0 = arith.constant 0 : i32
    %c0_i32_1 = arith.constant 0 : i32
    return %c0_i32, %c0_i32_0 : i32, i32
  }
  func.func @transform_7(%arg0: i32) -> (i32, i32) {
    %c0_i32 = arith.constant 0 : i32
    %c0_i32_0 = arith.constant 0 : i32
    %c0_i32_1 = arith.constant 0 : i32
    return %c0_i32, %c0_i32_0 : i32, i32
  }
  func.func @transform_8(%arg0: i32) -> (i32, i32) {
    %c0_i32 = arith.constant 0 : i32
    %c0_i32_0 = arith.constant 0 : i32
    %c0_i32_1 = arith.constant 0 : i32
    return %c0_i32, %c0_i32_0 : i32, i32
  }
  func.func @transform_9(%arg0: i32) -> (i32, i32) {
    %c0_i32 = arith.constant 0 : i32
    %c0_i32_0 = arith.constant 0 : i32
    %c0_i32_1 = arith.constant 0 : i32
    return %c0_i32, %c0_i32_0 : i32, i32
  }
  func.func @transform_10(%arg0: i32) -> (i32, i32) {
    %c0_i32 = arith.constant 0 : i32
    %c0_i32_0 = arith.constant 0 : i32
    %c0_i32_1 = arith.constant 0 : i32
    return %c0_i32, %c0_i32_0 : i32, i32
  }
  func.func @transform_11(%arg0: i32) -> (i32, i32, i32) {
    %c0_i32 = arith.constant 0 : i32
    %c0_i32_0 = arith.constant 0 : i32
    %c0_i32_1 = arith.constant 0 : i32
    %c0_i32_2 = arith.constant 0 : i32
    return %c0_i32, %c0_i32_0, %c0_i32_1 : i32, i32, i32
  }
  func.func @transform_12(%arg0: i32) -> (i32, i32) {
    %c0_i32 = arith.constant 0 : i32
    %c0_i32_0 = arith.constant 0 : i32
    %c0_i32_1 = arith.constant 0 : i32
    return %c0_i32, %c0_i32_0 : i32, i32
  }
  func.func @transform_13(%arg0: i32) -> (i32, i32, i32) {
    %c0_i32 = arith.constant 0 : i32
    %c0_i32_0 = arith.constant 0 : i32
    %c0_i32_1 = arith.constant 0 : i32
    %c0_i32_2 = arith.constant 0 : i32
    return %c0_i32, %c0_i32_0, %c0_i32_1 : i32, i32, i32
  }
  func.func @transform_14(%arg0: i32) -> (i32, i32) {
    %c0_i32 = arith.constant 0 : i32
    %c0_i32_0 = arith.constant 0 : i32
    %c0_i32_1 = arith.constant 0 : i32
    return %c0_i32, %c0_i32_0 : i32, i32
  }
  func.func @transform_15(%arg0: i32) -> (i32, i32, i32) {
    %c0_i32 = arith.constant 0 : i32
    %c0_i32_0 = arith.constant 0 : i32
    %c0_i32_1 = arith.constant 0 : i32
    return %arg0, %c0_i32, %c0_i32_0 : i32, i32, i32
  }
}

</mosaic_0001>

<bundles_post_ra>
// kernel: tpu_custom_call.1
= control target key start
LH: loop header
LB: loop body
LE: loop exit
PB: predicated region body
PF: predicated region fallthrough
CT: control target
= control target key end

     0   :  { %s2256_s0 = inlined_call_operand.vmem [shape: f32[2,8,32], index: 0, kind: input, shape index: {}]   ;;  %s2257_s1 = inlined_call_operand.vmem [shape: f32[2,1,8], index: 1, kind: input, shape index: {}]   ;;  %s2258_s2 = inlined_call_operand.vmem [shape: f32[2,8,1], index: 2, kind: input, shape index: {}]   ;;  %s2259_s3 = inlined_call_operand.vmem [shape: f32[1,32], index: 3, kind: input, shape index: {}]   ;;  %s2260_s4 = inlined_call_operand.vmem [shape: f32[1,32], index: 4, kind: input, shape index: {}]   ;;  %s2261_s5 = inlined_call_operand.vmem [shape: bf16[32,96], index: 5, kind: input, shape index: {}]   ;;  %s2262_s6 = inlined_call_operand.vmem [shape: f32[1,96], index: 6, kind: input, shape index: {}]   ;;  %s2263_s7 = inlined_call_operand.vmem [shape: bf16[32,32], index: 7, kind: input, shape index: {}]   ;;  %s2264_s8 = inlined_call_operand.vmem [shape: f32[1,32], index: 8, kind: input, shape index: {}]   ;;  %s2265_s9 = inlined_call_operand.vmem [shape: f32[1,32], index: 9, kind: input, shape index: {}]   ;;  %s2266_s10 = inlined_call_operand.vmem [shape: f32[1,32], index: 10, kind: input, shape index: {}]   ;;  %s2267_s11 = inlined_call_operand.vmem [shape: bf16[3,32,64], index: 11, kind: input, shape index: {}]   ;;  %s2268_s12 = inlined_call_operand.vmem [shape: f32[1,64], index: 12, kind: input, shape index: {}]   ;;  %s2269_s13 = inlined_call_operand.vmem [shape: bf16[3,64,32], index: 13, kind: input, shape index: {}]   ;;  %s2270_s14 = inlined_call_operand.vmem [shape: f32[1,32], index: 14, kind: input, shape index: {}]   ;;  %s2271_s15 = inlined_call_operand.hbm [shape: f32[2,8,32], index: 15, kind: output, shape index: {}]  }
   0x1   :  { %2273 = sst [smem:[#allocation8_spill]] %s2256_s0 }
   0x2   :  { %2274 = sst [smem:[#allocation9_spill]] %s2257_s1 }
   0x3   :  { %2275 = sst [smem:[#allocation10_spill]] %s2258_s2 }
   0x4   :  { %2276 = sst [smem:[#allocation11_spill]] %s2259_s3 }
   0x5   :  { %2277 = sst [smem:[#allocation12_spill]] %s2260_s4 }
   0x6   :  { %20 = vsyncpa [#allocation5], 0 }
   0x7   :  { %22 = vsyncpa [#allocation5 + $0x1], 0  ;;  %s1963_s18 = smov 0   ;;  %s1965_s19 = smov 0  }
   0x8   :  { %s1967_s20 = smov 0   ;;  %s1969_s21 = smov 0  }
   0x9 LB: > { %s1984_s22 = sadd.s32 4294967295, %s1871_s21   ;;  %s1512_s23 = sadd.s32 4294967294, %s1871_s21   ;;  %s1871_s21 = sphi %s1969_s21, %s2291_s21   ;;  %s1867_s20 = sphi %s1967_s20, %s2290_s20   ;;  %s1863_s19 = sphi %s1965_s19, %s2289_s19   ;;  %s1859_s18 = sphi %s1963_s18, %s2288_s18  }
   0xa   : > { %s1988_s24 = sadd.s32 1, %s1871_s21   ;;  %s365_s25 = sadd.s32 1, %s1867_s20 }
   0xb   : > { %s362_s26 = ssub.s32 %s1871_s21, %s1988_s24  ;;  %p375_p0 = scmp.ne.s32.totalorder %s1867_s20, %s1863_s19 }
   0xc   : > { %p363_p1 = scmp.eq.s32.totalorder %s362_s26, 0  ;;  %p376_p2 = scmp.eq.s32.totalorder %s1984_s22, 1 }
   0xd   : > { %p381_p3 = scmp.ne.s32.totalorder %s1863_s19, %s1859_s18  ;;  %p382_p4 = scmp.eq.s32.totalorder %s1512_s23, 1 }
   0xe   : > { %s1999_s27 = scalar_select %p363_p1, %s1867_s20, %s365_s25  }
   0xf   : > { %p2001_p5 = por %p376_p2, %p375_p0  ;;  %p2005_p6 = por %p382_p4, %p381_p3 }
  0x10   : > { %2278 = sst [smem:[#allocation7_spill]] %s1999_s27  ;;  %p1515_p7 = scmp.ge.s32.totalorder %s1871_s21, 1 }
  0x11   : > { %p456_p8 = scmp.lt.s32.totalorder %s1871_s21, 3 }
  0x13   : > { %p457_p9 = pnand %p1515_p7, %p456_p8 }
  0x14   : > { %p510_p10 = scmp.lt.s32.totalorder (!%p457_p9), %s1984_s22, 1  ;;  %s2281_s0 = sld [smem:[#allocation8_spill]] (!%p457_p9) }
  0x15   : > { %460 = sbr.rel (%p457_p9) target bundleno = 2289 (0x8f1), region = 80  ;;  %s2282_s3 = sld [smem:[#allocation11_spill]] (!%p457_p9) }
  0x16   : > { %s2283_s4 = sld [smem:[#allocation12_spill]] (!%p457_p9)  ;;  %s1875_s27 = smov (!%p457_p9), 96  }
  0x17   : > { %s1877_s26 = smov (!%p457_p9), 112   ;;  %s2284_s1 = sld [smem:[#allocation9_spill]] (!%p457_p9) }
  0x18   : > { %s2286_s2 = sld [smem:[#allocation10_spill]] (!%p457_p9)  ;;  %s1881_s17 = smov (!%p457_p9), 16  }
  0x1a   : > { %s2013_s30 = scalar_select %p510_p10, %s1984_s22, 1  ;;  %vm527_vm0 = vcmask 261120   ;;  %v1777_v7 = vld [vmem:[%s2261_s5 + $0x8] sm:$0xff]   ;;  %v1873_v8 = vmov 0.0   ;;  %vm1874_vm1 = vmmov 0   ;;  %v1778_v9 = vld [vmem:[%s2261_s5] sm:$0xff]   ;;  %v630_v34 = vlaneseq }
  0x1b   : > { %1628 = vmatprep.subr.bf16.mxu0 %v1873_v8  ;;  %1632 = vmatprep.mubr.msk.bf16.mxu0 %vm1874_vm1, %v1873_v8  ;;  %v1519_v14 = vld [vmem:[%s2282_s3] ss:$0 sm:$0xff]  ;;  %vm638_vm2 = vcmask 130048   ;;  %vm685_vm3 = vcmask 64512   ;;  %vm701_vm4 = vcmask 1043456   ;;  %vm861_vm5 = vcmask 261248  }
  0x1c   : > { %s2272_s16 = sshll.u32 %s2013_s30, 3  ;;  %1629 = vmatpush3.bf16.msra.mxu0 %v1777_v7  ;;  %1636 = vmatprep.subr.bf16.mxu1 %v1873_v8  ;;  %v1520_v16 = vld [vmem:[%s2283_s4] ss:$0 sm:$0xff]  ;;  %v2068_v37 = vshrl.u32 %v630_v34, 7  ;;  %vm1216_vm8 = vcmask 523264  }
  0x1d   : > { %s513_s25 = scalar_lea.vmem %s2281_s0, %s2272_s16  ;;  %1630 = vmatprep.subr.bf16.mxu0 %v1873_v8  ;;  %1638 = vmatprep.mubr.msk.bf16.mxu1 %vm1874_vm1, %v1873_v8  ;;  %v1521_v20 = vld [vmem:[%s2262_s6] ss:$0 sm:$0xff]  ;;  %s516_s23 = scalar_lea.vmem %s2284_s1, %s2013_s30 }
  0x1e   : > { %v2021_v0 = vld [vmem:[%s513_s25] sm:$0xff]  ;;  %s1876_s25 = smov 80   ;;  %v632_v39 = vsub.s32 0, %v2068_v37  ;;  %vm969_vm6 = vcmp.ge.s32.totalorder %v2068_v37, 1  ;;  %vm970_vm7 = vcmp.lt.s32.totalorder %v2068_v37, 7 }
  0x1f   : > { %v528_v1 = vsel %vm527_vm0, %v2021_v0, 0.0  ;;  %v523_v35 = vld [vmem:[%s516_s23] sm:$0x1] }
  0x20   : > { %529 = vadd.xlane.f32.xlu0 %v528_v1  ;;  %1631 = vmatpush3.bf16.msra.mxu0 %v1778_v9  ;;  %v1525_v36 = vadd.f32 -1.0, %v523_v35  ;;  %v1585_v37 = vld [vmem:[%s2270_s14] ss:$0 sm:$0xff] }
  0x21   : > { %1642 = vmatprep.subr.bf16.mxu0 %v1873_v8 }
  0x22   : > { %v626_v38 = vmul.f32 1e+09, %v1525_v36 }
  0x24   : > { %v633_v40 = vrot.slane %v626_v38, %v632_v39 }
  0xa9   : > { %v530_v2 = vpop.xlane.xlu0 %529 }
  0xaa   : > { %v532_v3 = vmul.f32 0.03125, %v530_v2 }
  0xac   : > { %v533_v4 = vsub.f32 %v2021_v0, %v532_v3 }
  0xae   : > { %v534_v5 = vmul.f32 %v533_v4, %v533_v4 }
  0xb0   : > { %v535_v6 = vsel %vm527_vm0, %v534_v5, 0.0 }
  0xb1   : > { %536 = vadd.xlane.f32.xlu0 %v535_v6  ;;  %v1779_v6 = vld [vmem:[%s2263_s7 + $0x8] sm:$0xff]  }
 0x13a   : > { %v537_v10 = vpop.xlane.xlu0 %536 }
 0x13b   : > { %v538_v11 = vmul.f32 0.03125, %v537_v10  ;;  %v1780_v10 = vld [vmem:[%s2263_s7] sm:$0xff]  }
 0x13d   : > { %v539_v12 = vadd.f32 1e-05, %v538_v11 }
 0x13f   : > { %1799 = vrsqrt.f32 %v539_v12 }
 0x14c   : > { %v1800_v13 = vpop.eup %1799 }
 0x14d   : > { %v541_v15 = vmul.f32 %v1800_v13, %v533_v4 }
 0x14f   : > { %v548_v17 = vmul.f32 %v1519_v14, %v541_v15 }
 0x151   : > { %v555_v18 = vadd.f32 %v1520_v16, %v548_v17 }
 0x153   : > { %v556_v19 = vpack.c.bf16 %v555_v18, %v555_v18  ;;  %v1880_v18 = vmov 0  }
 0x154   : > { %1776 = vset.pattern.permute.xlu0 %v1880_v18  ;;  %v1553_v18 = vld [vmem:[%s2268_s12] ss:$0 sm:$0xff] }
 0x155   : > { %1633 = vmatmul.mubr.msk.bf16.vlgmr.msra.gmra.mxu0 %vm527_vm0, %v556_v19 }
 0x156   : > { %1644 = vmatprep.mubr.msk.bf16.mxu0 %vm1874_vm1, %v1873_v8 }
 0x215   : > { %v617_v21 = vpop.f32.mrf.mxu0 }
 0x216   : > { %v618_v22 = vadd.f32 %v1521_v20, %v617_v21 }
 0x217   : > { %v1634_v23 = vpop.f32.mrf.mxu0 }
 0x218   : > { %623 = vst.msk [vmem:[#allocation2] sm:$0xff] %vm527_vm0, %v618_v22  ;;  %v624_v24 = vpack.c.bf16 %v618_v22, %v618_v22 }
 0x219   : > { %v620_v25 = vpop.f32.mrf.mxu0 }
 0x21a   : > { %636 = vrot.lane.b32.xlu1 %v624_v24, %s1875_s27  ;;  %s1878_s27 = smov 64  }
 0x21b   : > { %v1635_v26 = vpop.f32.mrf.mxu0 }
 0x21c   : > { %v1530_v26 = vld [vmem:[%s2264_s8] ss:$0 sm:$0xff] }
 0x21e   : > { %750 = vrot.lane.b32.xlu1 %v624_v24, %s1876_s25  ;;  %s1879_s25 = smov 48  }
 0x21f   : > { %v627_v27 = vld [vmem:[#allocation2] sm:$0xff] }
 0x220   : > { %v628_v28 = vpack.c.bf16 %v627_v27, %v627_v27 }
 0x222   : > { %748 = vrot.lane.b32.xlu0 %v628_v28, %s1877_s26  ;;  %s507_s26 = sand.u32 1, %s1863_s19  }
 0x223   : > { %s1419_s0 = scalar_lea.sflag [#allocation5], %s507_s26 }
 0x28c   : > { %v637_v29 = vpop.permute.xlu1 %636 }
 0x28d   : > { %v643_v30 = vsel %vm638_vm2, %v637_v29, 0 }
 0x28e   : > { %1637 = vmatpush3.bf16.xpose.msra.mxu1 %v643_v30 }
 0x28f   : > { %1648 = vmatprep.subr.bf16.mxu1 %v1873_v8 }
 0x290   : > { %v751_v31 = vpop.permute.xlu1 %750 }
 0x291   : > { %v756_v32 = vsel %vm638_vm2, %v751_v31, 0 }
 0x294   : > { %v749_v33 = vpop.permute.xlu0 %748 }
 0x295   : > { %1639 = vmatmul.mubr.msk.bf16.vlgmr.msra.gmra.mxu1 %vm638_vm2, %v628_v28 }
 0x296   : > { %1649 = vmatpush3.bf16.xpose.msra.mxu1 %v756_v32  ;;  %1650 = vmatprep.mubr.msk.bf16.mxu1 %vm1874_vm1, %v1873_v8 }
 0x297   : > { %1660 = vmatprep.subr.bf16.mxu1 %v1873_v8 }
 0x29d   : > { %1651 = vmatmul.mubr.msk.bf16.vlgmr.msra.gmra.mxu1 %vm638_vm2, %v749_v33 }
 0x29e   : > { %1664 = vmatprep.mubr.msk.bf16.mxu1 %vm1874_vm1, %v1873_v8  ;;  %1661 = vmatpush3.bf16.msra.mxu1 %v1779_v6  ;;  %v1793_v6 = vld [vmem:[%s2269_s13 + $0x8] sm:$0xff]  }
 0x29f   : > { %1662 = vmatprep.subr.bf16.mxu1 %v1873_v8 }
 0x2a2   : > { %1663 = vmatpush3.bf16.msra.mxu1 %v1780_v10 }
 0x2a3   : > { %1676 = vmatprep.subr.bf16.mxu1 %v1873_v8 }
 0x355   : > { %v679_v41 = vpop.f32.mrf.mxu1 }
 0x356   : > { %v680_v42 = vadd.f32 %v679_v41, %v633_v40 }
 0x357   : > { %v1640_v43 = vpop.f32.mrf.mxu1 }
 0x358   : > { %v686_v44 = vsel %vm685_vm3, %v680_v42, -inf  ;;  %v1783_v43 = vld [vmem:[%s2267_s11 + $0x10] sm:$0xff]  }
 0x359   : > { %687 = vmax.xlane.f32.xlu1 %v686_v44  ;;  %v682_v45 = vpop.f32.mrf.mxu1  ;;  %v1784_v44 = vld [vmem:[%s2267_s11] sm:$0xff]  }
 0x35b   : > { %v1641_v46 = vpop.f32.mrf.mxu1 }
 0x35d   : > { %v792_v47 = vpop.f32.mrf.mxu1 }
 0x35e   : > { %v793_v48 = vadd.f32 %v792_v47, %v633_v40 }
 0x35f   : > { %v1652_v49 = vpop.f32.mrf.mxu1 }
 0x360   : > { %v798_v50 = vsel %vm685_vm3, %v793_v48, -inf  ;;  %v1534_v49 = vld [vmem:[%s2265_s9] ss:$0 sm:$0xff] }
 0x361   : > { %799 = vmax.xlane.f32.xlu0 %v798_v50  ;;  %v795_v51 = vpop.f32.mrf.mxu1 }
 0x362   : > { %v1535_v51 = vld [vmem:[%s2266_s10] ss:$0 sm:$0xff] }
 0x363   : > { %v1653_v52 = vpop.f32.mrf.mxu1 }
 0x36a   : > { %696 = vrot.lane.b32.xlu1 %v624_v24, %s1878_s27  ;;  %s2285_s27 = sshll.u32 %s2013_s30, 3  ;;  %s1587_s30 = sshll.u32 %s1984_s22, 7 }
 0x36b   : > { %s520_s16 = scalar_lea.vmem %s2286_s2, %s2285_s27  ;;  %s1430_s2 = scalar_lea.hbm %s2271_s15, %s1587_s30 }
 0x36c   : > { %v524_v19 = vld [vmem:[%s520_s16] sm:$0xff]  ;;  %s1516_s16 = sshll.u32 %s507_s26, 3  ;;  %s1882_s22 = smov [#allocation4]  }
 0x36d   : > { %s509_s23 = scalar_lea.vmem [#allocation4], %s1516_s16  ;;  %s1815_s16 = sshll.u32 %s1882_s22, 4  ;;  %s1816_s16 = int_to_ptr.vmem [resolvable:$false] %s1815_s16 }
 0x36e   : > { %s1432_s27 = sshll.u32 %s509_s23, 4  ;;  %s1817_s3 = scalar_lea.vmem %s1816_s16, 256  ;;  %s1433_s27 = int_to_ptr.vmem [resolvable:$true] %s1432_s27 }
 0x36f   : > { %p1818_p0 = scmp.lt.s32.totalorder %s1433_s27, %s1816_s16 }
 0x377   : > { %808 = vrot.lane.b32.xlu0 %v624_v24, %s1879_s25 }
 0x3e2   : > { %v688_v53 = vpop.xlane.xlu1 %687 }
 0x3e3   : > { %v689_v54 = vsub.f32 %v680_v42, %v688_v53  ;;  %v1782_v42 = vld [vmem:[%s2267_s11 + $0x8] sm:$0xff]  }
 0x3e5   : > { %1801 = vpow2.f32 %v689_v54  ;;  %v1785_v54 = vld [vmem:[%s2267_s11 + $0x28] sm:$0xff]  }
 0x3e6   : > { %v697_v55 = vpop.permute.xlu1 %696 }
 0x3e7   : > { %v703_v56 = vsel %vm701_vm4, %v697_v55, 0 }
 0x3e8   : > { %1643 = vmatpush3.bf16.msra.mxu0 %v703_v56 }
 0x3e9   : > { %1654 = vmatprep.subr.bf16.mxu0 %v1873_v8 }
 0x3ea   : > { %v800_v57 = vpop.xlane.xlu0 %799 }
 0x3eb   : > { %v801_v58 = vsub.f32 %v793_v48, %v800_v57 }
 0x3ed   : > { %1803 = vpow2.f32 %v801_v58 }
 0x3ee   : > { %v809_v60 = vpop.permute.xlu0 %808 }
 0x3ef   : > { %v814_v63 = vsel %vm701_vm4, %v809_v60, 0  ;;  %v1786_v60 = vld [vmem:[%s2267_s11 + $0x20] sm:$0xff]  }
 0x3f2   : > { %v1802_v59 = vpop.eup %1801 }
 0x3f3   : > { %v691_v61 = vsel %vm685_vm3, %v1802_v59, 0.0  ;;  %v695_v62 = vpack.c.bf16 %v1802_v59, %v1802_v59 }
 0x3f4   : > { %692 = vadd.xlane.f32.xlu0 %v691_v61 }
 0x3f5   : > { %1645 = vmatmul.mubr.msk.bf16.vlgmr.msra.gmra.mxu0 %vm685_vm3, %v695_v62 }
 0x3f6   : > { %1655 = vmatpush3.bf16.msra.mxu0 %v814_v63  ;;  %1656 = vmatprep.mubr.msk.bf16.mxu0 %vm1874_vm1, %v1873_v8  ;;  %v1787_v63 = vld [vmem:[%s2269_s13 + $0x38] sm:$0xff]  }
 0x3f7   : > { %1668 = vmatprep.subr.bf16.mxu0 %v1873_v8 }
 0x3fa   : > { %v1804_v1 = vpop.eup %1803 }
 0x3fb   : > { %v803_v2 = vsel %vm685_vm3, %v1804_v1, 0.0  ;;  %v807_v3 = vpack.c.bf16 %v1804_v1, %v1804_v1  ;;  %v1788_v1 = vld [vmem:[%s2269_s13 + $0x30] sm:$0xff]  }
 0x3fc   : > { %804 = vadd.xlane.f32.xlu1 %v803_v2  ;;  %v1789_v2 = vld [vmem:[%s2269_s13 + $0x18] sm:$0xff]  }
 0x3fd   : > { %1657 = vmatmul.mubr.msk.bf16.vlgmr.msra.gmra.mxu0 %vm685_vm3, %v807_v3  ;;  %v1790_v3 = vld [vmem:[%s2269_s13 + $0x28] sm:$0xff]  }
 0x3fe   : > { %1672 = vmatprep.mubr.msk.bf16.mxu0 %vm1874_vm1, %v1873_v8 }
 0x40a   : > { %934 = vperm.xlu0 %1776, %v524_v19  }
 0x47d   : > { %v693_v4 = vpop.xlane.xlu0 %692 }
 0x47e   : > { %1805 = vrcp.f32 %v693_v4  ;;  %v1791_v4 = vld [vmem:[%s2269_s13 + $0x10] sm:$0xff]  }
 0x485   : > { %v805_v5 = vpop.xlane.xlu1 %804  ;;  %v2103_v30 = vpop.permute.xlu0 %934 }
 0x486   : > { %1807 = vrcp.f32 %v805_v5  ;;  %v1792_v5 = vld [vmem:[%s2269_s13 + $0x20] sm:$0xff]  }
 0x48b   : > { %v1806_v7 = vpop.eup %1805 }
 0x493   : > { %v1808_v15 = vpop.eup %1807 }
 0x4b5   : > { %v739_v9 = vpop.f32.mrf.mxu0 }
 0x4b6   : > { %v745_v11 = vmul.f32 %v1806_v7, %v739_v9  ;;  %v1794_v7 = vld [vmem:[%s2269_s13] sm:$0xff]  }
 0x4b7   : > { %v1646_v12 = vpop.f32.mrf.mxu0 }
 0x4b8   : > { %746 = vst.msk [vmem:[#allocation3] sm:$0xff] %vm638_vm2, %v745_v11 }
 0x4b9   : > { %v742_v13 = vpop.f32.mrf.mxu0 }
 0x4bb   : > { %v1647_v14 = vpop.f32.mrf.mxu0 }
 0x4bd   : > { %v850_v16 = vpop.f32.mrf.mxu0 }
 0x4be   : > { %v856_v17 = vmul.f32 %v1808_v15, %v850_v16 }
 0x4bf   : > { %v1658_v20 = vpop.f32.mrf.mxu0 }
 0x4c0   : > { %858 = vrot.lane.b32.xlu1 %v856_v17, %s1881_s17  ;;  %s1811_s17 = scalar_lea.vmem %s1433_s27, 128 }
 0x4c1   : > { %v853_v21 = vpop.f32.mrf.mxu0  ;;  %p1812_p11 = scmp.ne.s32.totalorder %s1433_s27, %s1811_s17  ;;  %p1819_p1 = scmp.lt.s32.totalorder %s1817_s3, %s1811_s17 }
 0x4c3   : > { %v1659_v22 = vpop.f32.mrf.mxu0  ;;  %p1813_p12 = pnand %p1812_p11, %p2001_p5  ;;  %p1820_p2 = por %p1819_p1, %p1818_p0 }
 0x4c5   : > { %p1814_p13 = pneg %p1813_p12 }
 0x4c7   : > { %p1821_p3 = pnand %p1820_p2, %p1814_p13 }
 0x532   : > { %v859_v23 = vpop.permute.xlu1 %858 }
 0x533   : > { %862 = vst.msk [vmem:[#allocation3] sm:$0xff] %vm861_vm5, %v859_v23 }
 0x53a   : > { %v863_v24 = vld [vmem:[#allocation3] sm:$0xff] }
 0x53b   : > { %v864_v25 = vpack.c.bf16 %v863_v24, %v863_v24 }
 0x53d   : > { %1665 = vmatmul.mubr.msk.bf16.vlgmr.msra.gmra.mxu1 %vm527_vm0, %v864_v25 }
 0x53e   : > { %1680 = vmatprep.mubr.msk.bf16.mxu1 %vm1874_vm1, %v1873_v8  ;;  %1677 = vmatpush3.bf16.msra.mxu1 %v1782_v42 }
 0x53f   : > { %1678 = vmatprep.subr.bf16.mxu1 %v1873_v8 }
 0x542   : > { %1679 = vmatpush3.bf16.msra.mxu1 %v1784_v44 }
 0x543   : > { %1692 = vmatprep.subr.bf16.mxu1 %v1873_v8 }
 0x5fd   : > { %v925_v27 = vpop.f32.mrf.mxu1 }
 0x5fe   : > { %v926_v28 = vadd.f32 %v1530_v26, %v925_v27  ;;  %v1795_v26 = vld [vmem:[%s2269_s13 + $0x58] sm:$0xff]  }
 0x5ff   : > { %v1666_v29 = vpop.f32.mrf.mxu1 }
 0x600   : > { %v931_v31 = vadd.f32 %v926_v28, %v2021_v0  ;;  %v1781_v0 = vld [vmem:[%s2267_s11 + $0x18] sm:$0xff]  }
 0x601   : > { %v928_v32 = vpop.f32.mrf.mxu1  ;;  %1669 = vmatpush3.bf16.msra.mxu0 %v1781_v0 }
 0x602   : > { %v2107_v33 = vmul.f32 %v2103_v30, %v931_v31  ;;  %1670 = vmatprep.subr.bf16.mxu0 %v1873_v8  ;;  %v1796_v32 = vld [vmem:[%s2269_s13 + $0x50] sm:$0xff]  }
 0x603   : > { %v1667_v34 = vpop.f32.mrf.mxu1 }
 0x604   : > { %v940_v35 = vsel %vm527_vm0, %v2107_v33, 0.0  ;;  %v1797_v34 = vld [vmem:[%s2269_s13 + $0x48] sm:$0xff]  }
 0x605   : > { %941 = vadd.xlane.f32.xlu1 %v940_v35  ;;  %1671 = vmatpush3.bf16.msra.mxu0 %v1783_v43 }
 0x606   : > { %1684 = vmatprep.subr.bf16.mxu0 %v1873_v8 }
 0x68e   : > { %v942_v36 = vpop.xlane.xlu1 %941 }
 0x68f   : > { %v943_v38 = vmul.f32 0.03125, %v942_v36  ;;  %v1798_v36 = vld [vmem:[%s2269_s13 + $0x40] sm:$0xff]  }
 0x691   : > { %v944_v39 = vsub.f32 %v2107_v33, %v943_v38 }
 0x693   : > { %v945_v40 = vmul.f32 %v944_v39, %v944_v39 }
 0x695   : > { %v946_v41 = vsel %vm527_vm0, %v945_v40, 0.0 }
 0x696   : > { %947 = vadd.xlane.f32.xlu1 %v946_v41 }
 0x71f   : > { %v948_v45 = vpop.xlane.xlu1 %947 }
 0x720   : > { %v949_v46 = vmul.f32 0.03125, %v948_v45 }
 0x722   : > { %v950_v47 = vadd.f32 1e-05, %v949_v46 }
 0x724   : > { %1809 = vrsqrt.f32 %v950_v47 }
 0x731   : > { %v1810_v48 = vpop.eup %1809 }
 0x732   : > { %v952_v50 = vmul.f32 %v1810_v48, %v944_v39 }
 0x734   : > { %v959_v52 = vmul.f32 %v1534_v49, %v952_v50 }
 0x736   : > { %v966_v53 = vadd.f32 %v1535_v51, %v959_v52 }
 0x738   : > { %v980_v55 = vpack.c.bf16 %v966_v53, %v966_v53  ;;  %v971_v56 = vrot.slane %v966_v53, 7  ;;  %v1096_v57 = vrot.slane %v966_v53, 1 }
 0x73a   : > { %1673 = vmatmul.mubr.msk.bf16.vlgmr.msra.gmra.mxu0 %vm527_vm0, %v980_v55  ;;  %v974_v58 = vsel %vm969_vm6, %v971_v56, 0.0  ;;  %v1099_v61 = vsel %vm970_vm7, %v1096_v57, 0.0 }
 0x73b   : > { %1685 = vmatpush3.bf16.msra.mxu0 %v1785_v54  ;;  %v975_v59 = vpack.c.bf16 %v974_v58, %v974_v58  ;;  %1688 = vmatprep.mubr.msk.bf16.mxu0 %vm1874_vm1, %v1873_v8  ;;  %v1100_v62 = vpack.c.bf16 %v1099_v61, %v1099_v61 }
 0x73c   : > { %1686 = vmatprep.subr.bf16.mxu0 %v1873_v8 }
 0x73d   : > { %1681 = vmatmul.mubr.msk.bf16.vlgmr.msra.gmra.mxu1 %vm527_vm0, %v975_v59 }
 0x73e   : > { %1700 = vmatprep.mubr.msk.bf16.mxu1 %vm1874_vm1, %v1873_v8  ;;  %1693 = vmatpush3.bf16.msra.mxu1 %v1787_v63 }
 0x73f   : > { %1687 = vmatpush3.bf16.msra.mxu0 %v1786_v60  ;;  %1694 = vmatprep.subr.bf16.mxu1 %v1873_v8 }
 0x740   : > { %1704 = vmatprep.subr.bf16.mxu0 %v1873_v8 }
 0x742   : > { %1689 = vmatmul.mubr.msk.bf16.vlgmr.msra.gmra.mxu0 %vm527_vm0, %v1100_v62  ;;  %1695 = vmatpush3.bf16.msra.mxu1 %v1788_v1 }
 0x743   : > { %1712 = vmatprep.mubr.msk.bf16.mxu0 %vm1874_vm1, %v1873_v8  ;;  %1705 = vmatpush3.bf16.msra.mxu0 %v1789_v2 }
 0x744   : > { %1696 = vmatprep.subr.bf16.mxu1 %v1873_v8  ;;  %1706 = vmatprep.subr.bf16.mxu0 %v1873_v8 }
 0x746   : > { %1697 = vmatpush3.bf16.msra.mxu1 %v1790_v3 }
 0x747   : > { %1707 = vmatpush3.bf16.msra.mxu0 %v1791_v4  ;;  %1698 = vmatprep.subr.bf16.mxu1 %v1873_v8 }
 0x748   : > { %1708 = vmatprep.subr.bf16.mxu0 %v1873_v8 }
 0x74a   : > { %1699 = vmatpush3.bf16.msra.mxu1 %v1792_v5 }
 0x74b   : > { %1709 = vmatpush3.bf16.msra.mxu0 %v1793_v6  ;;  %1716 = vmatprep.subr.bf16.mxu1 %v1873_v8 }
 0x74c   : > { %1710 = vmatprep.subr.bf16.mxu0 %v1873_v8 }
 0x74f   : > { %1711 = vmatpush3.bf16.msra.mxu0 %v1794_v7 }
 0x7fa   : > { %v1035_v9 = vpop.f32.mrf.mxu0 }
 0x7fc   : > { %v1674_v10 = vpop.f32.mrf.mxu0 }
 0x7fd   : > { %v1090_v11 = vpop.f32.mrf.mxu1 }
 0x7fe   : > { %v1038_v12 = vpop.f32.mrf.mxu0  ;;  %v1091_v15 = vadd.f32 %v1090_v11, %v1035_v9 }
 0x7ff   : > { %v1682_v13 = vpop.f32.mrf.mxu1 }
 0x800   : > { %v1675_v14 = vpop.f32.mrf.mxu0 }
 0x801   : > { %v1093_v16 = vpop.f32.mrf.mxu1 }
 0x802   : > { %v1155_v17 = vpop.f32.mrf.mxu0 }
 0x803   : > { %v1161_v19 = vadd.f32 %v1155_v17, %v1091_v15  ;;  %v1683_v20 = vpop.f32.mrf.mxu1 }
 0x804   : > { %v1690_v21 = vpop.f32.mrf.mxu0 }
 0x805   : > { %v1169_v22 = vadd.f32 %v1553_v18, %v1161_v19 }
 0x806   : > { %v1158_v23 = vpop.f32.mrf.mxu0 }
 0x807   : > { %v1170_v24 = vmax.f32 %v1169_v22, 0.0 }
 0x808   : > { %v1691_v25 = vpop.f32.mrf.mxu0 }
 0x809   : > { %v1171_v27 = vrot.slane %v1170_v24, 7  ;;  %v1182_v28 = vpack.c.bf16 %v1170_v24, %v1170_v24  ;;  %v1327_v35 = vrot.slane %v1170_v24, 1 }
 0x80b   : > { %v1172_v29 = vsel %vm969_vm6, %v1171_v27, 0.0  ;;  %1701 = vmatmul.mubr.msk.bf16.vlgmr.msra.gmra.mxu1 %vm1216_vm8, %v1182_v28  ;;  %v1328_v38 = vsel %vm970_vm7, %v1327_v35, 0.0 }
 0x80c   : > { %v1173_v31 = vpack.c.bf16 %v1172_v29, %v1172_v29  ;;  %1717 = vmatpush3.bf16.msra.mxu1 %v1795_v26  ;;  %1724 = vmatprep.mubr.msk.bf16.mxu1 %vm1874_vm1, %v1873_v8  ;;  %v1329_v39 = vpack.c.bf16 %v1328_v38, %v1328_v38 }
 0x80d   : > { %1718 = vmatprep.subr.bf16.mxu1 %v1873_v8 }
 0x80e   : > { %1713 = vmatmul.mubr.msk.bf16.vlgmr.msra.gmra.mxu0 %vm1216_vm8, %v1173_v31 }
 0x810   : > { %1719 = vmatpush3.bf16.msra.mxu1 %v1796_v32 }
 0x811   : > { %1720 = vmatprep.subr.bf16.mxu1 %v1873_v8 }
 0x814   : > { %1721 = vmatpush3.bf16.msra.mxu1 %v1797_v34 }
 0x815   : > { %1722 = vmatprep.subr.bf16.mxu1 %v1873_v8 }
 0x818   : > { %1723 = vmatpush3.bf16.msra.mxu1 %v1798_v36 }
 0x81b   : > { %1725 = vmatmul.mubr.msk.bf16.vlgmr.msra.gmra.mxu1 %vm1216_vm8, %v1329_v39 }
 0x8cb   : > { %v1254_v40 = vpop.f32.mrf.mxu1 }
 0x8cd   : > { %v1702_v41 = vpop.f32.mrf.mxu1 }
 0x8ce   : > { %v1321_v0 = vpop.f32.mrf.mxu0 }
 0x8cf   : > { %v1257_v42 = vpop.f32.mrf.mxu1  ;;  %v1322_v47 = vadd.f32 %v1321_v0, %v1254_v40 }
 0x8d0   : > { %v1714_v43 = vpop.f32.mrf.mxu0 }
 0x8d1   : > { %v1703_v44 = vpop.f32.mrf.mxu1 }
 0x8d2   : > { %v1324_v45 = vpop.f32.mrf.mxu0 }
 0x8d4   : > { %v1715_v46 = vpop.f32.mrf.mxu0 }
 0x8db   : > { %v1400_v8 = vpop.f32.mrf.mxu1 }
 0x8dc   : > { %v1406_v48 = vadd.f32 %v1400_v8, %v1322_v47 }
 0x8dd   : > { %v1726_v49 = vpop.f32.mrf.mxu1 }
 0x8de   : > { %v1414_v50 = vadd.f32 %v1585_v37, %v1406_v48 }
 0x8df   : > { %v1403_v51 = vpop.f32.mrf.mxu1 }
 0x8e0   : > { %v1415_v52 = vadd.f32 %v1414_v50, %v2107_v33 }
 0x8e1   : > { %v1727_v53 = vpop.f32.mrf.mxu1 }
 0x8e2   : > { %v1416_v54 = vmul.f32 %v1415_v52, %v2103_v30 }
 0x8e4   : > { %1417 = vst.msk [vmem:[%s509_s23] sm:$0xff] %vm527_vm0, %v1416_v54 }
 0x8e5   : > { %1824 = shalt.err (!%p1821_p3)
}
 0x8e6   : > { %s1825_s1 = scalar_lea.hbm %s1430_s2, 128  ;;  %s1829_s23 = scalar_lea.hbm %s2271_s15, 256 }
 0x8e7   : > { %p1826_p4 = scmp.ne.s32.totalorder %s1430_s2, %s1825_s1  ;;  %p1830_p9 = scmp.lt.s32.totalorder %s1430_s2, %s2271_s15 }
 0x8e8   : > { %p1831_p10 = scmp.lt.s32.totalorder %s1829_s23, %s1825_s1 }
 0x8e9   : > { %p1827_p7 = pnand %p1826_p4, %p2001_p5 }
 0x8ea   : > { %p1832_p11 = por %p1831_p10, %p1830_p9 }
 0x8eb   : > { %p1828_p8 = pneg %p1827_p7 }
 0x8ed   : > { %p1833_p12 = pnand %p1832_p11, %p1828_p8 }
 0x8ef   : > { %1836 = shalt.err (!%p1833_p12)
}
 0x8f0   : > { %1728 = dma.vmem_to_hbm [thread:$0]  (%p2001_p5), %s1433_s27, 128, %s1430_s2, %s1419_s0  }
 0x8f1 PF: > { %p1734_p13 = scmp.ge.s32.totalorder %s1871_s21, 2  ;;  %s1444_s3 = sand.u32 1, %s1859_s18  }
 0x8f2   : > { %s1445_s17 = scalar_lea.sflag [#allocation5], %s1444_s3 }
 0x8f3   : > { %p1731_p0 = pnand %p1734_p13, %p2005_p6 }
 0x8f5   : > { %p1732_p1 = pneg %p1731_p0 }
 0x8f7   : > { %1854 = dma.done.wait (%p1732_p1), %s1445_s17, 128  }
 0x8f8   : > { %1856 = vsyncadd (%p1732_p1), %s1445_s17, 4294967168  ;;  %s2287_s4 = sld [smem:[#allocation7_spill]]  ;;  %p25_p2 = scmp.ge.s32.totalorder %s1988_s24, 4  }
 0x8f9   : > { %s2288_s18 = smov %s1863_s19  ;;  %s2289_s19 = smov %s1867_s20 }
 0x8fa   : > { %s2291_s21 = smov %s1988_s24  ;;  %27 = sbr.rel (!%p25_p2) target bundleno = 9 (0x9), region = 125 }
 0x8fe   : > { %s2290_s20 = smov %s2287_s4 }
 0x8ff   :  { %1450 = vsyncpa [#allocation5], 1 }
 0x900   :  { %1452 = vsyncpa [#allocation5 + $0x1], 1 }

</bundles_post_ra>
